<compile_context>
chip_gen: v7x
topology: tpu7x:2x2x1
jax: 0.10.0
libtpu: 0.0.40
codegen_flags: <defaults>
</compile_context>

<pallas_src>
import math
import functools

import jax
import jax.numpy as jnp
from jax import lax
from jax.experimental import pallas as pl
from jax.experimental.pallas import tpu as pltpu

# ----------------------------- config ---------------------------------------
N_EMBD = 32
N_HEAD = 4
HEAD_DIM = N_EMBD // N_HEAD
LN_EPS = 1e-5


# --------------------------- kernel helpers ----------------------------------
def _layernorm(x, gamma, beta):
    # x: (R, C), gamma/beta: (1, C)
    mean = jnp.mean(x, axis=-1, keepdims=True)
    xc = x - mean
    var = jnp.mean(xc * xc, axis=-1, keepdims=True)
    inv = lax.rsqrt(var + LN_EPS)
    return xc * inv * gamma + beta


def _gelu_tanh(x):
    # GELU with tanh approximation (matches nn.GELU(approximate='tanh'))
    c = math.sqrt(2.0 / math.pi)
    return 0.5 * x * (1.0 + jnp.tanh(c * (x + 0.044715 * x * x * x)))


# ------------------------------ kernel ---------------------------------------
def block_kernel(x_ref,
                 ln1_g_ref, ln1_b_ref,
                 w_attn_ref, b_attn_ref,
                 w_aproj_ref, b_aproj_ref,
                 ln2_g_ref, ln2_b_ref,
                 w_fc_ref, b_fc_ref,
                 w_mproj_ref, b_mproj_ref,
                 o_ref,
                 *, seq_len, n_head, head_batched, mxu_bf16):
    x = x_ref[...]                         # (R, C): R = BB*T rows of this chunk
    R, C = x.shape
    T = seq_len
    BB = R // T
    H = n_head
    hd = C // H
    scale = 1.0 / math.sqrt(hd)

    # Cast only MXU operands (bf16 on v6e/v7x at real sizes); LN / GELU /
    # softmax statistics stay f32 on the VPU/EUP.
    if mxu_bf16:
        mx = lambda t: t.astype(jnp.bfloat16)      # noqa: E731
    else:
        mx = lambda t: t                           # noqa: E731

    # ---- attention branch ---------------------------------------------------
    h = _layernorm(x, ln1_g_ref[...], ln1_b_ref[...])
    qkv = jnp.dot(mx(h), mx(w_attn_ref[...]),
                  preferred_element_type=jnp.float32) + b_attn_ref[...]
    q = qkv[:, 0 * C:1 * C] * scale        # fold 1/sqrt(hd) into q once
    k = qkv[:, 1 * C:2 * C]
    v = qkv[:, 2 * C:3 * C]

    # additive causal bias, (1, T, T), broadcast over the whole score batch
    row = lax.broadcasted_iota(jnp.int32, (1, T, T), 1)
    col = lax.broadcasted_iota(jnp.int32, (1, T, T), 2)
    mask_bias = jnp.where(col <= row, 0.0, -1e30).astype(jnp.float32)

    def softmax_pv(qb, kb, vb):
        # qb/kb/vb: (batch, T, hd) -> (batch, T, hd); batch is BB*H (batched
        # path) or BB (fallback path).
        s = jnp.einsum('btd,bsd->bts', mx(qb), mx(kb),
                       preferred_element_type=jnp.float32)
        s = s + mask_bias
        m = jnp.max(s, axis=-1, keepdims=True)
        e = jnp.exp(s - m)
        # exact f32 divide (correctness: the approx EUP reciprocal was the
        # dominant error term in the previous run)
        p = e / jnp.sum(e, axis=-1, keepdims=True)
        return jnp.einsum('bts,bsd->btd', mx(p), mx(vb),
                          preferred_element_type=jnp.float32)

    if head_batched:
        # Head-major (BB*H, T, hd) relayout via the lane-layout-aware einshape:
        # one relayout per tensor, ONE batched einsum pair for all heads.
        def split_heads(t2):
            t3 = t2.reshape(BB, T, C)                         # leading split
            t4 = pltpu.einshape('bt(hd)->bhtd', t3, h=H, d=hd)
            return t4.reshape(BB * H, T, hd)                  # leading merge

        oh = softmax_pv(split_heads(q), split_heads(k), split_heads(v))
        y = pltpu.einshape('bhtd->bt(hd)', oh.reshape(BB, H, T, hd))
        y = y.reshape(R, C)
    else:
        # Portable fallback: static per-head loop (lane slices + lane concat),
        # identical math, previously validated lowering.
        q3 = q.reshape(BB, T, C)
        k3 = k.reshape(BB, T, C)
        v3 = v.reshape(BB, T, C)
        outs = []
        for hh in range(H):
            sl = slice(hh * hd, (hh + 1) * hd)
            oh = softmax_pv(q3[:, :, sl], k3[:, :, sl], v3[:, :, sl])
            outs.append(oh.reshape(R, hd))
        y = jnp.concatenate(outs, axis=-1)

    y = jnp.dot(mx(y), mx(w_aproj_ref[...]),
                preferred_element_type=jnp.float32) + b_aproj_ref[...]
    x1 = x + y                                               # residual 1

    # ---- MLP branch ---------------------------------------------------------
    h2 = _layernorm(x1, ln2_g_ref[...], ln2_b_ref[...])
    f = jnp.dot(mx(h2), mx(w_fc_ref[...]),
                preferred_element_type=jnp.float32) + b_fc_ref[...]
    g = _gelu_tanh(f)
    mlp = jnp.dot(mx(g), mx(w_mproj_ref[...]),
                  preferred_element_type=jnp.float32) + b_mproj_ref[...]

    o_ref[...] = (x1 + mlp).astype(o_ref.dtype)              # residual 2


# ------------------------------ wrapper ---------------------------------------
@functools.partial(jax.jit,
                   static_argnames=("batch_block", "head_batched", "mxu_bf16"))
def transformer_block(x, params, batch_block=None, head_batched=True,
                      mxu_bf16=False):
    B, T, C = x.shape
    (ln1_g, ln1_b, w_attn, b_attn, w_aproj, b_aproj,
     ln2_g, ln2_b, w_fc, b_fc, w_mproj, b_mproj) = params

    # Grid: default one step over the whole batch (amortizes the ~600-cycle
    # per-step overhead; right call for 1-TC v5e/v6e at these sizes).
    # On v7x pass batch_block <= B // 2 so the "parallel" axis has >= 2 steps
    # to shard across the two TensorCores, and re-derive the VMEM budget
    # against its 64 MiB (roughly half the v6e batch_block).
    BB = B if batch_block is None else batch_block
    assert B % BB == 0
    grid_steps = B // BB
    rows = BB * T

    x2 = x.reshape(B * T, C)               # fold (B, T) -> rows in the wrapper
    weights = (ln1_g, ln1_b, w_attn, b_attn, w_aproj, b_aproj,
               ln2_g, ln2_b, w_fc, b_fc, w_mproj, b_mproj)

    def wspec(shape):
        # Constant index map -> weights fetched once, VMEM-resident.  With
        # more than one grid step, single-buffer them (no point double-
        # buffering constants; halves their VMEM footprint at GPT-scale C).
        if grid_steps > 1:
            return pl.BlockSpec(shape, lambda i: (0,) * len(shape),
                                pipeline_mode=pl.Buffered(1))
        return pl.BlockSpec(shape, lambda i: (0,) * len(shape))

    kernel = functools.partial(block_kernel, seq_len=T, n_head=N_HEAD,
                               head_batched=head_batched, mxu_bf16=mxu_bf16)

    out2 = pl.pallas_call(
        kernel,
        out_shape=jax.ShapeDtypeStruct((B * T, C), x.dtype),
        grid_spec=pltpu.PrefetchScalarGridSpec(
            num_scalar_prefetch=0,
            grid=(grid_steps,),
            in_specs=[pl.BlockSpec((rows, C), lambda i: (i, 0))]
                     + [wspec(w.shape) for w in weights],
            out_specs=pl.BlockSpec((rows, C), lambda i: (i, 0)),
        ),
        compiler_params=pltpu.CompilerParams(
            dimension_semantics=("parallel",)),
    )(x2, *weights)
    return out2.reshape(B, T, C)


# ------------------------- pure-JAX reference ---------------------------------
def reference_block(x, params):
    (ln1_g, ln1_b, w_attn, b_attn, w_aproj, b_aproj,
     ln2_g, ln2_b, w_fc, b_fc, w_mproj, b_mproj) = params
    B, T, C = x.shape

    def ln(z, g, b):
        mu = jnp.mean(z, axis=-1, keepdims=True)
        var = jnp.mean((z - mu) ** 2, axis=-1, keepdims=True)
        return (z - mu) / jnp.sqrt(var + LN_EPS) * g + b

    h = ln(x, ln1_g, ln1_b)
    qkv = h @ w_attn + b_attn
    q, k, v = jnp.split(qkv, 3, axis=-1)
    q = q.reshape(B, T, N_HEAD, HEAD_DIM).transpose(0, 2, 1, 3)
    k = k.reshape(B, T, N_HEAD, HEAD_DIM).transpose(0, 2, 1, 3)
    v = v.reshape(B, T, N_HEAD, HEAD_DIM).transpose(0, 2, 1, 3)
    att = (q @ jnp.swapaxes(k, -2, -1)) / math.sqrt(HEAD_DIM)
    mask = jnp.tril(jnp.ones((T, T), dtype=bool))
    att = jnp.where(mask, att, -jnp.inf)
    att = jax.nn.softmax(att, axis=-1)
    y = (att @ v).transpose(0, 2, 1, 3).reshape(B, T, C)
    y = y @ w_aproj + b_aproj
    x = x + y
    h2 = ln(x, ln2_g, ln2_b)
    f = h2 @ w_fc + b_fc
    g = 0.5 * f * (1.0 + jnp.tanh(math.sqrt(2.0 / math.pi)
                                  * (f + 0.044715 * f ** 3)))
    return x + (g @ w_mproj + b_mproj)


# ------------------------------- main ------------------------------------------
if __name__ == "__main__":
    key = jax.random.PRNGKey(0)
    B, T, C = 2, 8, N_EMBD

    keys = jax.random.split(key, 10)
    x = jax.random.normal(keys[0], (B, T, C), dtype=jnp.float32)

    def init_w(k, shape, fan_in):
        return (jax.random.normal(k, shape, dtype=jnp.float32)
                / math.sqrt(fan_in))

    # Deterministic synthetic parameters (shapes per nn module __init__).
    ln1_g = jnp.ones((1, C), jnp.float32)
    ln1_b = jnp.zeros((1, C), jnp.float32)
    w_attn = init_w(keys[1], (C, 3 * C), C)           # c_attn (pre-transposed)
    b_attn = 0.01 * jnp.ones((1, 3 * C), jnp.float32)
    w_aproj = init_w(keys[2], (C, C), C)              # attn c_proj
    b_aproj = 0.01 * jnp.ones((1, C), jnp.float32)
    ln2_g = jnp.ones((1, C), jnp.float32)
    ln2_b = jnp.zeros((1, C), jnp.float32)
    w_fc = init_w(keys[3], (C, 4 * C), C)             # mlp c_fc
    b_fc = 0.01 * jnp.ones((1, 4 * C), jnp.float32)
    w_mproj = init_w(keys[4], (4 * C, C), 4 * C)      # mlp c_proj
    b_mproj = 0.01 * jnp.ones((1, C), jnp.float32)

    params = (ln1_g, ln1_b, w_attn, b_attn, w_aproj, b_aproj,
              ln2_g, ln2_b, w_fc, b_fc, w_mproj, b_mproj)

    # Reference at true-f32 matmul precision (the XLA default on TPU demotes
    # f32 dots to bf16 passes, which skews the comparison against the f32
    # Mosaic matmuls in the kernel).
    with jax.default_matmul_precision("highest"):
        ref = reference_block(x, params)
    ref = jax.block_until_ready(ref)

    def run(head_batched):
        out = transformer_block(x, params, head_batched=head_batched)
        return jax.block_until_ready(out)

    # Expected error is ~1e-5 with the exact softmax divide; the tolerance
    # leaves margin for backends that demote f32 matmul passes.
    tol = dict(atol=5e-3, rtol=5e-3)

    try:
        out = run(True)                       # head-batched einshape path
        ok = bool(jnp.allclose(out, ref, **tol))
    except Exception:                          # noqa: BLE001
        out, ok = None, False
    if not ok:
        # TODO(synk): head-batched einshape relayout unsupported/mismatched on
        # this Mosaic build -- use the portable per-head path instead.
        out = run(False)
        ok = bool(jnp.allclose(out, ref, **tol))

    assert out.shape == (B, T, C)
    max_err = float(jnp.max(jnp.abs(out - ref)))
    assert ok, max_err

    print("KERNEL_OK")
</pallas_src>

<mosaic_0001>
module attributes {stable_mosaic.version = 11 : i64} {
  func.func @block_kernel(%arg0: i32, %arg1: memref<16x32xf32, #tpu.memory_space<vmem>>, %arg2: memref<1x32xf32, #tpu.memory_space<vmem>>, %arg3: memref<1x32xf32, #tpu.memory_space<vmem>>, %arg4: memref<32x96xf32, #tpu.memory_space<vmem>>, %arg5: memref<1x96xf32, #tpu.memory_space<vmem>>, %arg6: memref<32x32xf32, #tpu.memory_space<vmem>>, %arg7: memref<1x32xf32, #tpu.memory_space<vmem>>, %arg8: memref<1x32xf32, #tpu.memory_space<vmem>>, %arg9: memref<1x32xf32, #tpu.memory_space<vmem>>, %arg10: memref<32x128xf32, #tpu.memory_space<vmem>>, %arg11: memref<1x128xf32, #tpu.memory_space<vmem>>, %arg12: memref<128x32xf32, #tpu.memory_space<vmem>>, %arg13: memref<1x32xf32, #tpu.memory_space<vmem>>, %arg14: memref<16x32xf32, #tpu.memory_space<vmem>>) attributes {dimension_semantics = [#tpu.dimension_semantics<parallel>], iteration_bounds = array<i64: 1>, scalar_prefetch = 0 : i64, scratch_operands = 0 : i64, tpu.core_type = #tpu.core_type<tc>, window_params = [{transform_indices = @transform_0, window_bounds = array<i64: 16, 32>}, {pipeline_mode = #tpu.pipeline_mode<synchronous>, transform_indices = @transform_1, window_bounds = array<i64: 1, 32>}, {pipeline_mode = #tpu.pipeline_mode<synchronous>, transform_indices = @transform_2, window_bounds = array<i64: 1, 32>}, {pipeline_mode = #tpu.pipeline_mode<synchronous>, transform_indices = @transform_3, window_bounds = array<i64: 32, 96>}, {pipeline_mode = #tpu.pipeline_mode<synchronous>, transform_indices = @transform_4, window_bounds = array<i64: 1, 96>}, {pipeline_mode = #tpu.pipeline_mode<synchronous>, transform_indices = @transform_5, window_bounds = array<i64: 32, 32>}, {pipeline_mode = #tpu.pipeline_mode<synchronous>, transform_indices = @transform_6, window_bounds = array<i64: 1, 32>}, {pipeline_mode = #tpu.pipeline_mode<synchronous>, transform_indices = @transform_7, window_bounds = array<i64: 1, 32>}, {pipeline_mode = #tpu.pipeline_mode<synchronous>, transform_indices = @transform_8, window_bounds = array<i64: 1, 32>}, {pipeline_mode = #tpu.pipeline_mode<synchronous>, transform_indices = @transform_9, window_bounds = array<i64: 32, 128>}, {pipeline_mode = #tpu.pipeline_mode<synchronous>, transform_indices = @transform_10, window_bounds = array<i64: 1, 128>}, {pipeline_mode = #tpu.pipeline_mode<synchronous>, transform_indices = @transform_11, window_bounds = array<i64: 128, 32>}, {pipeline_mode = #tpu.pipeline_mode<synchronous>, transform_indices = @transform_12, window_bounds = array<i64: 1, 32>}, {transform_indices = @transform_13, window_bounds = array<i64: 16, 32>}]} {
    %c0 = arith.constant 0 : index
    %c0_0 = arith.constant 0 : index
    %0 = vector.load %arg1[%c0, %c0_0] : memref<16x32xf32, #tpu.memory_space<vmem>>, vector<16x32xf32>
    %c0_1 = arith.constant 0 : index
    %c0_2 = arith.constant 0 : index
    %1 = vector.load %arg2[%c0_1, %c0_2] : memref<1x32xf32, #tpu.memory_space<vmem>>, vector<1x32xf32>
    %c0_3 = arith.constant 0 : index
    %c0_4 = arith.constant 0 : index
    %2 = vector.load %arg3[%c0_3, %c0_4] : memref<1x32xf32, #tpu.memory_space<vmem>>, vector<1x32xf32>
    %cst = arith.constant dense<0.000000e+00> : vector<16xf32>
    %3 = vector.multi_reduction <add>, %0, %cst [1] : vector<16x32xf32> to vector<16xf32>
    %4 = vector.shape_cast %3 : vector<16xf32> to vector<16x1xf32>
    %cst_5 = arith.constant 3.200000e+01 : f32
    %5 = vector.broadcast %cst_5 : f32 to vector<16x1xf32>
    %6 = arith.divf %4, %5 : vector<16x1xf32>
    %7 = vector.broadcast %6 : vector<16x1xf32> to vector<16x32xf32>
    %8 = arith.subf %0, %7 : vector<16x32xf32>
    %9 = arith.mulf %8, %8 : vector<16x32xf32>
    %cst_6 = arith.constant dense<0.000000e+00> : vector<16xf32>
    %10 = vector.multi_reduction <add>, %9, %cst_6 [1] : vector<16x32xf32> to vector<16xf32>
    %11 = vector.shape_cast %10 : vector<16xf32> to vector<16x1xf32>
    %cst_7 = arith.constant 3.200000e+01 : f32
    %12 = vector.broadcast %cst_7 : f32 to vector<16x1xf32>
    %13 = arith.divf %11, %12 : vector<16x1xf32>
    %cst_8 = arith.constant 9.99999974E-6 : f32
    %14 = vector.broadcast %cst_8 : f32 to vector<16x1xf32>
    %15 = arith.addf %13, %14 : vector<16x1xf32>
    %16 = math.rsqrt %15 : vector<16x1xf32>
    %17 = vector.broadcast %16 : vector<16x1xf32> to vector<16x32xf32>
    %18 = arith.mulf %8, %17 : vector<16x32xf32>
    %19 = vector.broadcast %1 : vector<1x32xf32> to vector<16x32xf32>
    %20 = arith.mulf %18, %19 : vector<16x32xf32>
    %21 = vector.broadcast %2 : vector<1x32xf32> to vector<16x32xf32>
    %22 = arith.addf %20, %21 : vector<16x32xf32>
    %c0_9 = arith.constant 0 : index
    %c0_10 = arith.constant 0 : index
    %23 = vector.load %arg4[%c0_9, %c0_10] : memref<32x96xf32, #tpu.memory_space<vmem>>, vector<32x96xf32>
    %cst_11 = arith.constant dense<0.000000e+00> : vector<16x96xf32>
    %24 = tpu.matmul %22, %23, %cst_11 {dimension_numbers = #tpu.dot_dimension_numbers<[1], [0], [0], [1], [0, 0, 1, 1], [], []>} : vector<16x32xf32>, vector<32x96xf32>, vector<16x96xf32> -> vector<16x96xf32>
    %c0_12 = arith.constant 0 : index
    %c0_13 = arith.constant 0 : index
    %25 = vector.load %arg5[%c0_12, %c0_13] : memref<1x96xf32, #tpu.memory_space<vmem>>, vector<1x96xf32>
    %26 = vector.broadcast %25 : vector<1x96xf32> to vector<16x96xf32>
    %27 = arith.addf %24, %26 : vector<16x96xf32>
    %28 = vector.extract_strided_slice %27 {offsets = [0, 0], sizes = [16, 32], strides = [1, 1]} : vector<16x96xf32> to vector<16x32xf32>
    %cst_14 = arith.constant 0.353553385 : f32
    %29 = vector.broadcast %cst_14 : f32 to vector<16x32xf32>
    %30 = arith.mulf %28, %29 : vector<16x32xf32>
    %31 = vector.extract_strided_slice %27 {offsets = [0, 32], sizes = [16, 32], strides = [1, 1]} : vector<16x96xf32> to vector<16x32xf32>
    %32 = vector.extract_strided_slice %27 {offsets = [0, 64], sizes = [16, 32], strides = [1, 1]} : vector<16x96xf32> to vector<16x32xf32>
    %33 = tpu.iota {dimensions = array<i32: 1>} : vector<1x8x8xi32>
    %34 = tpu.iota {dimensions = array<i32: 2>} : vector<1x8x8xi32>
    %35 = arith.cmpi sle, %34, %33 : vector<1x8x8xi32>
    %cst_15 = arith.constant 0.000000e+00 : f32
    %cst_16 = arith.constant -1.000000e+30 : f32
    %36 = vector.broadcast %cst_15 : f32 to vector<1x8x8xf32>
    %37 = vector.broadcast %cst_16 : f32 to vector<1x8x8xf32>
    %38 = arith.select %35, %36, %37 : vector<1x8x8xi1>, vector<1x8x8xf32>
    %39 = vector.shape_cast %30 : vector<16x32xf32> to vector<2x8x32xf32>
    %40 = vector.shape_cast %31 : vector<16x32xf32> to vector<2x8x32xf32>
    %41 = vector.shape_cast %32 : vector<16x32xf32> to vector<2x8x32xf32>
    %42 = vector.extract_strided_slice %39 {offsets = [0, 0, 0], sizes = [2, 8, 8], strides = [1, 1, 1]} : vector<2x8x32xf32> to vector<2x8x8xf32>
    %43 = vector.extract_strided_slice %40 {offsets = [0, 0, 0], sizes = [2, 8, 8], strides = [1, 1, 1]} : vector<2x8x32xf32> to vector<2x8x8xf32>
    %44 = vector.extract_strided_slice %41 {offsets = [0, 0, 0], sizes = [2, 8, 8], strides = [1, 1, 1]} : vector<2x8x32xf32> to vector<2x8x8xf32>
    "tpu.trace_start"() <{level = 10 : i32, message = "btd,bsd->bts"}> : () -> ()
    %cst_17 = arith.constant dense<0.000000e+00> : vector<2x8x8xf32>
    %45 = tpu.matmul %42, %43, %cst_17 {dimension_numbers = #tpu.dot_dimension_numbers<[2], [2], [1], [1], [0, 0, 0, 1, 1, 1], [0], [0]>} : vector<2x8x8xf32>, vector<2x8x8xf32>, vector<2x8x8xf32> -> vector<2x8x8xf32>
    "tpu.trace_stop"() : () -> ()
    %46 = vector.broadcast %38 : vector<1x8x8xf32> to vector<2x8x8xf32>
    %47 = arith.addf %45, %46 : vector<2x8x8xf32>
    %cst_18 = arith.constant dense<0xFF800000> : vector<2x8xf32>
    %48 = vector.multi_reduction <maximumf>, %47, %cst_18 [2] : vector<2x8x8xf32> to vector<2x8xf32>
    %49 = vector.shape_cast %48 : vector<2x8xf32> to vector<2x8x1xf32>
    %50 = vector.broadcast %49 : vector<2x8x1xf32> to vector<2x8x8xf32>
    %51 = arith.subf %47, %50 : vector<2x8x8xf32>
    %52 = math.exp %51 : vector<2x8x8xf32>
    %cst_19 = arith.constant dense<0.000000e+00> : vector<2x8xf32>
    %53 = vector.multi_reduction <add>, %52, %cst_19 [2] : vector<2x8x8xf32> to vector<2x8xf32>
    %54 = vector.shape_cast %53 : vector<2x8xf32> to vector<2x8x1xf32>
    %55 = vector.broadcast %54 : vector<2x8x1xf32> to vector<2x8x8xf32>
    %56 = arith.divf %52, %55 : vector<2x8x8xf32>
    "tpu.trace_start"() <{level = 10 : i32, message = "bts,bsd->btd"}> : () -> ()
    %cst_20 = arith.constant dense<0.000000e+00> : vector<2x8x8xf32>
    %57 = tpu.matmul %56, %44, %cst_20 {dimension_numbers = #tpu.dot_dimension_numbers<[2], [1], [1], [2], [0, 0, 0, 1, 1, 2], [0], [0]>} : vector<2x8x8xf32>, vector<2x8x8xf32>, vector<2x8x8xf32> -> vector<2x8x8xf32>
    "tpu.trace_stop"() : () -> ()
    %58 = vector.shape_cast %57 : vector<2x8x8xf32> to vector<16x8xf32>
    %59 = vector.extract_strided_slice %39 {offsets = [0, 0, 8], sizes = [2, 8, 8], strides = [1, 1, 1]} : vector<2x8x32xf32> to vector<2x8x8xf32>
    %60 = vector.extract_strided_slice %40 {offsets = [0, 0, 8], sizes = [2, 8, 8], strides = [1, 1, 1]} : vector<2x8x32xf32> to vector<2x8x8xf32>
    %61 = vector.extract_strided_slice %41 {offsets = [0, 0, 8], sizes = [2, 8, 8], strides = [1, 1, 1]} : vector<2x8x32xf32> to vector<2x8x8xf32>
    "tpu.trace_start"() <{level = 10 : i32, message = "btd,bsd->bts"}> : () -> ()
    %cst_21 = arith.constant dense<0.000000e+00> : vector<2x8x8xf32>
    %62 = tpu.matmul %59, %60, %cst_21 {dimension_numbers = #tpu.dot_dimension_numbers<[2], [2], [1], [1], [0, 0, 0, 1, 1, 1], [0], [0]>} : vector<2x8x8xf32>, vector<2x8x8xf32>, vector<2x8x8xf32> -> vector<2x8x8xf32>
    "tpu.trace_stop"() : () -> ()
    %63 = vector.broadcast %38 : vector<1x8x8xf32> to vector<2x8x8xf32>
    %64 = arith.addf %62, %63 : vector<2x8x8xf32>
    %cst_22 = arith.constant dense<0xFF800000> : vector<2x8xf32>
    %65 = vector.multi_reduction <maximumf>, %64, %cst_22 [2] : vector<2x8x8xf32> to vector<2x8xf32>
    %66 = vector.shape_cast %65 : vector<2x8xf32> to vector<2x8x1xf32>
    %67 = vector.broadcast %66 : vector<2x8x1xf32> to vector<2x8x8xf32>
    %68 = arith.subf %64, %67 : vector<2x8x8xf32>
    %69 = math.exp %68 : vector<2x8x8xf32>
    %cst_23 = arith.constant dense<0.000000e+00> : vector<2x8xf32>
    %70 = vector.multi_reduction <add>, %69, %cst_23 [2] : vector<2x8x8xf32> to vector<2x8xf32>
    %71 = vector.shape_cast %70 : vector<2x8xf32> to vector<2x8x1xf32>
    %72 = vector.broadcast %71 : vector<2x8x1xf32> to vector<2x8x8xf32>
    %73 = arith.divf %69, %72 : vector<2x8x8xf32>
    "tpu.trace_start"() <{level = 10 : i32, message = "bts,bsd->btd"}> : () -> ()
    %cst_24 = arith.constant dense<0.000000e+00> : vector<2x8x8xf32>
    %74 = tpu.matmul %73, %61, %cst_24 {dimension_numbers = #tpu.dot_dimension_numbers<[2], [1], [1], [2], [0, 0, 0, 1, 1, 2], [0], [0]>} : vector<2x8x8xf32>, vector<2x8x8xf32>, vector<2x8x8xf32> -> vector<2x8x8xf32>
    "tpu.trace_stop"() : () -> ()
    %75 = vector.shape_cast %74 : vector<2x8x8xf32> to vector<16x8xf32>
    %76 = vector.extract_strided_slice %39 {offsets = [0, 0, 16], sizes = [2, 8, 8], strides = [1, 1, 1]} : vector<2x8x32xf32> to vector<2x8x8xf32>
    %77 = vector.extract_strided_slice %40 {offsets = [0, 0, 16], sizes = [2, 8, 8], strides = [1, 1, 1]} : vector<2x8x32xf32> to vector<2x8x8xf32>
    %78 = vector.extract_strided_slice %41 {offsets = [0, 0, 16], sizes = [2, 8, 8], strides = [1, 1, 1]} : vector<2x8x32xf32> to vector<2x8x8xf32>
    "tpu.trace_start"() <{level = 10 : i32, message = "btd,bsd->bts"}> : () -> ()
    %cst_25 = arith.constant dense<0.000000e+00> : vector<2x8x8xf32>
    %79 = tpu.matmul %76, %77, %cst_25 {dimension_numbers = #tpu.dot_dimension_numbers<[2], [2], [1], [1], [0, 0, 0, 1, 1, 1], [0], [0]>} : vector<2x8x8xf32>, vector<2x8x8xf32>, vector<2x8x8xf32> -> vector<2x8x8xf32>
    "tpu.trace_stop"() : () -> ()
    %80 = vector.broadcast %38 : vector<1x8x8xf32> to vector<2x8x8xf32>
    %81 = arith.addf %79, %80 : vector<2x8x8xf32>
    %cst_26 = arith.constant dense<0xFF800000> : vector<2x8xf32>
    %82 = vector.multi_reduction <maximumf>, %81, %cst_26 [2] : vector<2x8x8xf32> to vector<2x8xf32>
    %83 = vector.shape_cast %82 : vector<2x8xf32> to vector<2x8x1xf32>
    %84 = vector.broadcast %83 : vector<2x8x1xf32> to vector<2x8x8xf32>
    %85 = arith.subf %81, %84 : vector<2x8x8xf32>
    %86 = math.exp %85 : vector<2x8x8xf32>
    %cst_27 = arith.constant dense<0.000000e+00> : vector<2x8xf32>
    %87 = vector.multi_reduction <add>, %86, %cst_27 [2] : vector<2x8x8xf32> to vector<2x8xf32>
    %88 = vector.shape_cast %87 : vector<2x8xf32> to vector<2x8x1xf32>
    %89 = vector.broadcast %88 : vector<2x8x1xf32> to vector<2x8x8xf32>
    %90 = arith.divf %86, %89 : vector<2x8x8xf32>
    "tpu.trace_start"() <{level = 10 : i32, message = "bts,bsd->btd"}> : () -> ()
    %cst_28 = arith.constant dense<0.000000e+00> : vector<2x8x8xf32>
    %91 = tpu.matmul %90, %78, %cst_28 {dimension_numbers = #tpu.dot_dimension_numbers<[2], [1], [1], [2], [0, 0, 0, 1, 1, 2], [0], [0]>} : vector<2x8x8xf32>, vector<2x8x8xf32>, vector<2x8x8xf32> -> vector<2x8x8xf32>
    "tpu.trace_stop"() : () -> ()
    %92 = vector.shape_cast %91 : vector<2x8x8xf32> to vector<16x8xf32>
    %93 = vector.extract_strided_slice %39 {offsets = [0, 0, 24], sizes = [2, 8, 8], strides = [1, 1, 1]} : vector<2x8x32xf32> to vector<2x8x8xf32>
    %94 = vector.extract_strided_slice %40 {offsets = [0, 0, 24], sizes = [2, 8, 8], strides = [1, 1, 1]} : vector<2x8x32xf32> to vector<2x8x8xf32>
    %95 = vector.extract_strided_slice %41 {offsets = [0, 0, 24], sizes = [2, 8, 8], strides = [1, 1, 1]} : vector<2x8x32xf32> to vector<2x8x8xf32>
    "tpu.trace_start"() <{level = 10 : i32, message = "btd,bsd->bts"}> : () -> ()
    %cst_29 = arith.constant dense<0.000000e+00> : vector<2x8x8xf32>
    %96 = tpu.matmul %93, %94, %cst_29 {dimension_numbers = #tpu.dot_dimension_numbers<[2], [2], [1], [1], [0, 0, 0, 1, 1, 1], [0], [0]>} : vector<2x8x8xf32>, vector<2x8x8xf32>, vector<2x8x8xf32> -> vector<2x8x8xf32>
    "tpu.trace_stop"() : () -> ()
    %97 = vector.broadcast %38 : vector<1x8x8xf32> to vector<2x8x8xf32>
    %98 = arith.addf %96, %97 : vector<2x8x8xf32>
    %cst_30 = arith.constant dense<0xFF800000> : vector<2x8xf32>
    %99 = vector.multi_reduction <maximumf>, %98, %cst_30 [2] : vector<2x8x8xf32> to vector<2x8xf32>
    %100 = vector.shape_cast %99 : vector<2x8xf32> to vector<2x8x1xf32>
    %101 = vector.broadcast %100 : vector<2x8x1xf32> to vector<2x8x8xf32>
    %102 = arith.subf %98, %101 : vector<2x8x8xf32>
    %103 = math.exp %102 : vector<2x8x8xf32>
    %cst_31 = arith.constant dense<0.000000e+00> : vector<2x8xf32>
    %104 = vector.multi_reduction <add>, %103, %cst_31 [2] : vector<2x8x8xf32> to vector<2x8xf32>
    %105 = vector.shape_cast %104 : vector<2x8xf32> to vector<2x8x1xf32>
    %106 = vector.broadcast %105 : vector<2x8x1xf32> to vector<2x8x8xf32>
    %107 = arith.divf %103, %106 : vector<2x8x8xf32>
    "tpu.trace_start"() <{level = 10 : i32, message = "bts,bsd->btd"}> : () -> ()
    %cst_32 = arith.constant dense<0.000000e+00> : vector<2x8x8xf32>
    %108 = tpu.matmul %107, %95, %cst_32 {dimension_numbers = #tpu.dot_dimension_numbers<[2], [1], [1], [2], [0, 0, 0, 1, 1, 2], [0], [0]>} : vector<2x8x8xf32>, vector<2x8x8xf32>, vector<2x8x8xf32> -> vector<2x8x8xf32>
    "tpu.trace_stop"() : () -> ()
    %109 = vector.shape_cast %108 : vector<2x8x8xf32> to vector<16x8xf32>
    %110 = tpu.concatenate %58, %75, %92, %109 in 1 : vector<16x8xf32>, vector<16x8xf32>, vector<16x8xf32>, vector<16x8xf32> -> vector<16x32xf32>
    %c0_33 = arith.constant 0 : index
    %c0_34 = arith.constant 0 : index
    %111 = vector.load %arg6[%c0_33, %c0_34] : memref<32x32xf32, #tpu.memory_space<vmem>>, vector<32x32xf32>
    %cst_35 = arith.constant dense<0.000000e+00> : vector<16x32xf32>
    %112 = tpu.matmul %110, %111, %cst_35 {dimension_numbers = #tpu.dot_dimension_numbers<[1], [0], [0], [1], [0, 0, 1, 1], [], []>} : vector<16x32xf32>, vector<32x32xf32>, vector<16x32xf32> -> vector<16x32xf32>
    %c0_36 = arith.constant 0 : index
    %c0_37 = arith.constant 0 : index
    %113 = vector.load %arg7[%c0_36, %c0_37] : memref<1x32xf32, #tpu.memory_space<vmem>>, vector<1x32xf32>
    %114 = vector.broadcast %113 : vector<1x32xf32> to vector<16x32xf32>
    %115 = arith.addf %112, %114 : vector<16x32xf32>
    %116 = arith.addf %0, %115 : vector<16x32xf32>
    %c0_38 = arith.constant 0 : index
    %c0_39 = arith.constant 0 : index
    %117 = vector.load %arg8[%c0_38, %c0_39] : memref<1x32xf32, #tpu.memory_space<vmem>>, vector<1x32xf32>
    %c0_40 = arith.constant 0 : index
    %c0_41 = arith.constant 0 : index
    %118 = vector.load %arg9[%c0_40, %c0_41] : memref<1x32xf32, #tpu.memory_space<vmem>>, vector<1x32xf32>
    %cst_42 = arith.constant dense<0.000000e+00> : vector<16xf32>
    %119 = vector.multi_reduction <add>, %116, %cst_42 [1] : vector<16x32xf32> to vector<16xf32>
    %120 = vector.shape_cast %119 : vector<16xf32> to vector<16x1xf32>
    %cst_43 = arith.constant 3.200000e+01 : f32
    %121 = vector.broadcast %cst_43 : f32 to vector<16x1xf32>
    %122 = arith.divf %120, %121 : vector<16x1xf32>
    %123 = vector.broadcast %122 : vector<16x1xf32> to vector<16x32xf32>
    %124 = arith.subf %116, %123 : vector<16x32xf32>
    %125 = arith.mulf %124, %124 : vector<16x32xf32>
    %cst_44 = arith.constant dense<0.000000e+00> : vector<16xf32>
    %126 = vector.multi_reduction <add>, %125, %cst_44 [1] : vector<16x32xf32> to vector<16xf32>
    %127 = vector.shape_cast %126 : vector<16xf32> to vector<16x1xf32>
    %cst_45 = arith.constant 3.200000e+01 : f32
    %128 = vector.broadcast %cst_45 : f32 to vector<16x1xf32>
    %129 = arith.divf %127, %128 : vector<16x1xf32>
    %cst_46 = arith.constant 9.99999974E-6 : f32
    %130 = vector.broadcast %cst_46 : f32 to vector<16x1xf32>
    %131 = arith.addf %129, %130 : vector<16x1xf32>
    %132 = math.rsqrt %131 : vector<16x1xf32>
    %133 = vector.broadcast %132 : vector<16x1xf32> to vector<16x32xf32>
    %134 = arith.mulf %124, %133 : vector<16x32xf32>
    %135 = vector.broadcast %117 : vector<1x32xf32> to vector<16x32xf32>
    %136 = arith.mulf %134, %135 : vector<16x32xf32>
    %137 = vector.broadcast %118 : vector<1x32xf32> to vector<16x32xf32>
    %138 = arith.addf %136, %137 : vector<16x32xf32>
    %c0_47 = arith.constant 0 : index
    %c0_48 = arith.constant 0 : index
    %139 = vector.load %arg10[%c0_47, %c0_48] : memref<32x128xf32, #tpu.memory_space<vmem>>, vector<32x128xf32>
    %cst_49 = arith.constant dense<0.000000e+00> : vector<16x128xf32>
    %140 = tpu.matmul %138, %139, %cst_49 {dimension_numbers = #tpu.dot_dimension_numbers<[1], [0], [0], [1], [0, 0, 1, 1], [], []>} : vector<16x32xf32>, vector<32x128xf32>, vector<16x128xf32> -> vector<16x128xf32>
    %c0_50 = arith.constant 0 : index
    %c0_51 = arith.constant 0 : index
    %141 = vector.load %arg11[%c0_50, %c0_51] : memref<1x128xf32, #tpu.memory_space<vmem>>, vector<1x128xf32>
    %142 = vector.broadcast %141 : vector<1x128xf32> to vector<16x128xf32>
    %143 = arith.addf %140, %142 : vector<16x128xf32>
    %cst_52 = arith.constant 5.000000e-01 : f32
    %144 = vector.broadcast %cst_52 : f32 to vector<16x128xf32>
    %145 = arith.mulf %144, %143 : vector<16x128xf32>
    %cst_53 = arith.constant 4.471500e-02 : f32
    %146 = vector.broadcast %cst_53 : f32 to vector<16x128xf32>
    %147 = arith.mulf %146, %143 : vector<16x128xf32>
    %148 = arith.mulf %147, %143 : vector<16x128xf32>
    %149 = arith.mulf %148, %143 : vector<16x128xf32>
    %150 = arith.addf %143, %149 : vector<16x128xf32>
    %cst_54 = arith.constant 0.797884583 : f32
    %151 = vector.broadcast %cst_54 : f32 to vector<16x128xf32>
    %152 = arith.mulf %151, %150 : vector<16x128xf32>
    %153 = math.tanh %152 : vector<16x128xf32>
    %cst_55 = arith.constant 1.000000e+00 : f32
    %154 = vector.broadcast %cst_55 : f32 to vector<16x128xf32>
    %155 = arith.addf %154, %153 : vector<16x128xf32>
    %156 = arith.mulf %145, %155 : vector<16x128xf32>
    %c0_56 = arith.constant 0 : index
    %c0_57 = arith.constant 0 : index
    %157 = vector.load %arg12[%c0_56, %c0_57] : memref<128x32xf32, #tpu.memory_space<vmem>>, vector<128x32xf32>
    %cst_58 = arith.constant dense<0.000000e+00> : vector<16x32xf32>
    %158 = tpu.matmul %156, %157, %cst_58 {dimension_numbers = #tpu.dot_dimension_numbers<[1], [0], [0], [1], [0, 0, 1, 1], [], []>} : vector<16x128xf32>, vector<128x32xf32>, vector<16x32xf32> -> vector<16x32xf32>
    %c0_59 = arith.constant 0 : index
    %c0_60 = arith.constant 0 : index
    %159 = vector.load %arg13[%c0_59, %c0_60] : memref<1x32xf32, #tpu.memory_space<vmem>>, vector<1x32xf32>
    %160 = vector.broadcast %159 : vector<1x32xf32> to vector<16x32xf32>
    %161 = arith.addf %158, %160 : vector<16x32xf32>
    %162 = arith.addf %116, %161 : vector<16x32xf32>
    %c0_61 = arith.constant 0 : index
    %c0_62 = arith.constant 0 : index
    %163 = vector.load %arg14[%c0_61, %c0_62] : memref<16x32xf32, #tpu.memory_space<vmem>>, vector<16x32xf32>
    tpu.vector_store %arg14[%c0_61, %c0_62], %162 {strides = array<i32>} : memref<16x32xf32, #tpu.memory_space<vmem>>, vector<16x32xf32>,
    return
  }
  func.func @transform_0(%arg0: i32) -> (i32, i32) {
    %c0_i32 = arith.constant 0 : i32
    %c0_i32_0 = arith.constant 0 : i32
    return %arg0, %c0_i32 : i32, i32
  }
  func.func @transform_1(%arg0: i32) -> (i32, i32) {
    %c0_i32 = arith.constant 0 : i32
    %c0_i32_0 = arith.constant 0 : i32
    %c0_i32_1 = arith.constant 0 : i32
    return %c0_i32, %c0_i32_0 : i32, i32
  }
  func.func @transform_2(%arg0: i32) -> (i32, i32) {
    %c0_i32 = arith.constant 0 : i32
    %c0_i32_0 = arith.constant 0 : i32
    %c0_i32_1 = arith.constant 0 : i32
    return %c0_i32, %c0_i32_0 : i32, i32
  }
  func.func @transform_3(%arg0: i32) -> (i32, i32) {
    %c0_i32 = arith.constant 0 : i32
    %c0_i32_0 = arith.constant 0 : i32
    %c0_i32_1 = arith.constant 0 : i32
    return %c0_i32, %c0_i32_0 : i32, i32
  }
  func.func @transform_4(%arg0: i32) -> (i32, i32) {
    %c0_i32 = arith.constant 0 : i32
    %c0_i32_0 = arith.constant 0 : i32
    %c0_i32_1 = arith.constant 0 : i32
    return %c0_i32, %c0_i32_0 : i32, i32
  }
  func.func @transform_5(%arg0: i32) -> (i32, i32) {
    %c0_i32 = arith.constant 0 : i32
    %c0_i32_0 = arith.constant 0 : i32
    %c0_i32_1 = arith.constant 0 : i32
    return %c0_i32, %c0_i32_0 : i32, i32
  }
  func.func @transform_6(%arg0: i32) -> (i32, i32) {
    %c0_i32 = arith.constant 0 : i32
    %c0_i32_0 = arith.constant 0 : i32
    %c0_i32_1 = arith.constant 0 : i32
    return %c0_i32, %c0_i32_0 : i32, i32
  }
  func.func @transform_7(%arg0: i32) -> (i32, i32) {
    %c0_i32 = arith.constant 0 : i32
    %c0_i32_0 = arith.constant 0 : i32
    %c0_i32_1 = arith.constant 0 : i32
    return %c0_i32, %c0_i32_0 : i32, i32
  }
  func.func @transform_8(%arg0: i32) -> (i32, i32) {
    %c0_i32 = arith.constant 0 : i32
    %c0_i32_0 = arith.constant 0 : i32
    %c0_i32_1 = arith.constant 0 : i32
    return %c0_i32, %c0_i32_0 : i32, i32
  }
  func.func @transform_9(%arg0: i32) -> (i32, i32) {
    %c0_i32 = arith.constant 0 : i32
    %c0_i32_0 = arith.constant 0 : i32
    %c0_i32_1 = arith.constant 0 : i32
    return %c0_i32, %c0_i32_0 : i32, i32
  }
  func.func @transform_10(%arg0: i32) -> (i32, i32) {
    %c0_i32 = arith.constant 0 : i32
    %c0_i32_0 = arith.constant 0 : i32
    %c0_i32_1 = arith.constant 0 : i32
    return %c0_i32, %c0_i32_0 : i32, i32
  }
  func.func @transform_11(%arg0: i32) -> (i32, i32) {
    %c0_i32 = arith.constant 0 : i32
    %c0_i32_0 = arith.constant 0 : i32
    %c0_i32_1 = arith.constant 0 : i32
    return %c0_i32, %c0_i32_0 : i32, i32
  }
  func.func @transform_12(%arg0: i32) -> (i32, i32) {
    %c0_i32 = arith.constant 0 : i32
    %c0_i32_0 = arith.constant 0 : i32
    %c0_i32_1 = arith.constant 0 : i32
    return %c0_i32, %c0_i32_0 : i32, i32
  }
  func.func @transform_13(%arg0: i32) -> (i32, i32) {
    %c0_i32 = arith.constant 0 : i32
    %c0_i32_0 = arith.constant 0 : i32
    return %arg0, %c0_i32 : i32, i32
  }
}

</mosaic_0001>

<bundles_post_ra>
// kernel: transformer_block.1
= control target key start
LH: loop header
LB: loop body
LE: loop exit
PB: predicated region body
PF: predicated region fallthrough
CT: control target
= control target key end

     0   :  { %vm49_vm0 = vcmask 261120   ;;  %s2709_s0 = inlined_call_operand.vmem [shape: f32[16,32], index: 0, kind: input, shape index: {}]   ;;  %s2710_s1 = inlined_call_operand.vmem [shape: f32[1,32], index: 1, kind: input, shape index: {}]   ;;  %s2711_s2 = inlined_call_operand.vmem [shape: f32[1,32], index: 2, kind: input, shape index: {}]   ;;  %s2712_s3 = inlined_call_operand.vmem [shape: f32[32,96], index: 3, kind: input, shape index: {}]   ;;  %s2713_s4 = inlined_call_operand.vmem [shape: f32[1,96], index: 4, kind: input, shape index: {}]   ;;  %s2714_s5 = inlined_call_operand.vmem [shape: f32[32,32], index: 5, kind: input, shape index: {}]   ;;  %s2715_s6 = inlined_call_operand.vmem [shape: f32[1,32], index: 6, kind: input, shape index: {}]   ;;  %s2716_s7 = inlined_call_operand.vmem [shape: f32[1,32], index: 7, kind: input, shape index: {}]   ;;  %s2717_s8 = inlined_call_operand.vmem [shape: f32[1,32], index: 8, kind: input, shape index: {}]   ;;  %s2718_s9 = inlined_call_operand.vmem [shape: f32[32,128], index: 9, kind: input, shape index: {}]   ;;  %s2719_s10 = inlined_call_operand.vmem [shape: f32[1,128], index: 10, kind: input, shape index: {}]   ;;  %s2720_s11 = inlined_call_operand.vmem [shape: f32[128,32], index: 11, kind: input, shape index: {}]   ;;  %s2721_s12 = inlined_call_operand.vmem [shape: f32[1,32], index: 12, kind: input, shape index: {}]   ;;  %s2722_s13 = inlined_call_operand.hbm [shape: f32[16,32], index: 13, kind: output, shape index: {}]  }
   0x1   :  { %v2401_v0 = vld [vmem:[%s2709_s0] sm:$0xff]  ;;  %v2406_v1 = vld [vmem:[%s2709_s0 + $0x8] sm:$0xff] }
   0x2   :  { %18 = vsyncpa [#allocation3], 0  ;;  %v50_v2 = vsel %vm49_vm0, %v2401_v0, 0.0  ;;  %v53_v3 = vsel %vm49_vm0, %v2406_v1, 0.0  ;;  %v93_v14 = vld [vmem:[%s2712_s3] sm:$0xff]  ;;  %v94_v15 = vld [vmem:[%s2712_s3 + $0x8] sm:$0xff]  ;;  %v187_v46 = vlaneseq }
   0x3   :  { %51 = vadd.xlane.f32.xlu0 %v50_v2  ;;  %v95_v16 = vld [vmem:[%s2712_s3 + $0x10] sm:$0xff]  ;;  %v2166_v17 = vpack.c.bf16 %v94_v15, %v93_v14  ;;  %v96_v18 = vld [vmem:[%s2712_s3 + $0x18] sm:$0xff]  ;;  %v1912_v27 = vld [vmem:[%s2710_s1] ss:$0 sm:$0xff]  ;;  %v2309_v36 = vmov 0.0   ;;  %vm2310_vm1 = vmmov 0  }
   0x4   :  { %v2170_v19 = vpack.c.bf16 %v96_v18, %v95_v16  ;;  %v1913_v29 = vld [vmem:[%s2711_s2] ss:$0 sm:$0xff]  ;;  %2039 = vmatprep.subr.mxu0 %v2309_v36  ;;  %2041 = vmatprep.mubr.msk.f32.mxu0 %vm2310_vm1, %v2309_v36  ;;  %s2311_s22 = smov 96   ;;  %vm196_vm2 = vcmask 64512   ;;  %v188_v47 = vshrl.u32 %v187_v46, 7  ;;  %v190_v48 = vand.u32 127, %v187_v46 }
   0x5   :  { %2167 = vmatprep.subr.bf16.mxu1 %v2166_v17  ;;  %v1914_v37 = vld [vmem:[%s2713_s4] ss:$0 sm:$0xff]  ;;  %v2312_v49 = vmov -1e+30   ;;  %s2313_s4 = smov 64   ;;  %s2314_s23 = smov 88  }
   0x6   :  { %2169 = vmatpush3.bf16.msra.mxu1 %v2166_v17  ;;  %vm191_vm3 = vcmp.le.s32.totalorder %v190_v48, %v188_v47  ;;  %s2315_s24 = smov 120   ;;  %s2316_s25 = smov 56   ;;  %vm1543_vm4 = vcmask 195584   ;;  %vm1540_vm5 = vcmask 130048  }
   0x7   :  { %54 = vadd.xlane.f32.xlu0 %v53_v3  ;;  %2171 = vmatprep.subr.bf16.mxu1 %v2170_v19  ;;  %v2469_v50 = vsel %vm191_vm3, 0.0, %v2312_v49  ;;  %s2317_s26 = smov 80   ;;  %s2318_s27 = smov 112  }
   0x8   :  { %s2319_s28 = smov 48   ;;  %s2320_s0 = smov 72  }
   0x9   :  { %s2321_s29 = smov 104   ;;  %s2322_s30 = smov 40  }
   0xa   :  { %2173 = vmatpush3.bf16.msra.mxu1 %v2170_v19  ;;  %s2323_s14 = smov 8   ;;  %s2324_s15 = smov 16  }
   0xb   :  { %2029 = vmatprep.subr.mxu1 %v2309_v36  ;;  %s2325_s2 = smov 24  }
  0x90   :  { %v52_v4 = vpop.xlane.xlu0 %51 }
  0x91   :  { %v57_v5 = vmul.f32 0.03125, %v52_v4 }
  0x93   :  { %v59_v6 = vsub.f32 %v2401_v0, %v57_v5 }
  0x94   :  { %v55_v7 = vpop.xlane.xlu0 %54 }
  0x95   :  { %v58_v8 = vmul.f32 0.03125, %v55_v7  ;;  %v61_v9 = vmul.f32 %v59_v6, %v59_v6 }
  0x97   :  { %v60_v10 = vsub.f32 %v2406_v1, %v58_v8  ;;  %v63_v11 = vsel %vm49_vm0, %v61_v9, 0.0 }
  0x98   :  { %64 = vadd.xlane.f32.xlu1 %v63_v11 }
  0x99   :  { %v62_v12 = vmul.f32 %v60_v10, %v60_v10 }
  0x9b   :  { %v66_v13 = vsel %vm49_vm0, %v62_v12, 0.0 }
  0x9c   :  { %67 = vadd.xlane.f32.xlu1 %v66_v13 }
 0x125   :  { %v65_v20 = vpop.xlane.xlu1 %64 }
 0x126   :  { %v69_v21 = vmul.f32 0.03125, %v65_v20 }
 0x128   :  { %v71_v22 = vadd.f32 1e-05, %v69_v21 }
 0x129   :  { %v68_v23 = vpop.xlane.xlu1 %67 }
 0x12a   :  { %2241 = vrsqrt.f32 %v71_v22  ;;  %v70_v24 = vmul.f32 0.03125, %v68_v23 }
 0x12c   :  { %v72_v25 = vadd.f32 1e-05, %v70_v24 }
 0x12e   :  { %2243 = vrsqrt.f32 %v72_v25 }
 0x134   :  { %v2242_v26 = vpop.eup %2241 }
 0x135   :  { %v75_v28 = vmul.f32 %v2242_v26, %v59_v6 }
 0x137   :  { %v83_v30 = vmul.f32 %v1912_v27, %v75_v28 }
 0x138   :  { %v2244_v31 = vpop.eup %2243 }
 0x139   :  { %v76_v32 = vmul.f32 %v2244_v31, %v60_v10  ;;  %v91_v33 = vadd.f32 %v1913_v29, %v83_v30 }
 0x13b   :  { %v84_v34 = vmul.f32 %v1912_v27, %v76_v32  ;;  %2026 = vmatprep.mubr.msk.f32.mxu1 %vm49_vm0, %v91_v33 }
 0x13d   :  { %v92_v35 = vadd.f32 %v1913_v29, %v84_v34 }
 0x13f   :  { %2027 = vmatmul.mubr.msk.f32.vlgmr.msra.gmra.mrb[0].mxu1 %vm49_vm0, %v92_v35 }
 0x140   :  { %2031 = vmatprep.mubr.msk.f32.mxu1 %vm2310_vm1, %v2309_v36 }
 0x212   :  { %v2028_v38 = vpop.f32.mrb[0].mxu1 }
 0x213   :  { %v2445_v39 = vadd.f32 %v2028_v38, %v1914_v37  ;;  %v176_v40 = vpop.f32.mrb[1].mxu1 }
 0x214   :  { %v2447_v41 = vadd.f32 %v1914_v37, %v176_v40 }
 0x215   :  { %273 = vrot.lane.b32.xlu1 %v2445_v39, %s2311_s22  ;;  %v2462_v45 = vmul.f32 0.35355338, %v2445_v39 }
 0x216   :  { %194 = vrot.lane.b32.xlu0 %v2447_v41, %s2311_s22  ;;  %v2453_v43 = vmul.f32 0.35355338, %v2447_v41 }
 0x287   :  { %v274_v44 = vpop.permute.xlu1 %273 }
 0x288   :  { %v195_v42 = vpop.permute.xlu0 %194 }
 0x289   :  { %2030 = vmatpush3.xpose.msk.msra.mxu1 %vm196_vm2, %v195_v42 }
 0x28a   :  { %2034 = vmatprep.subr.mxu1 %v2309_v36 }
 0x28c   :  { %2032 = vmatmul.mubr.msk.f32.vlgmr.msra.gmra.mrb[2].mxu1 %vm196_vm2, %v2453_v43 }
 0x28d   :  { %2035 = vmatpush3.xpose.msk.msra.mxu1 %vm196_vm2, %v274_v44  ;;  %2036 = vmatprep.mubr.msk.f32.mxu1 %vm2310_vm1, %v2309_v36 }
 0x28e   :  { %2044 = vmatprep.subr.mxu1 %v2309_v36 }
 0x290   :  { %2037 = vmatmul.mubr.msk.f32.vlgmr.msra.gmra.mrb[4].mxu1 %vm196_vm2, %v2462_v45 }
 0x291   :  { %2046 = vmatprep.mubr.msk.f32.mxu1 %vm2310_vm1, %v2309_v36 }
 0x35f   :  { %v268_v51 = vpop.f32.mrb[2].mxu1 }
 0x360   :  { %v269_v52 = vadd.f32 %v268_v51, %v2469_v50  ;;  %v2033_v53 = vpop.f32.mrb[3].mxu1 }
 0x362   :  { %v350_v54 = vsel %vm196_vm2, %v269_v52, -inf }
 0x363   :  { %351 = vmax.xlane.f32.xlu1 %v350_v54  ;;  %v346_v55 = vpop.f32.mrb[4].mxu1 }
 0x364   :  { %v347_v56 = vadd.f32 %v346_v55, %v2469_v50  ;;  %v2038_v57 = vpop.f32.mrb[5].mxu1 }
 0x366   :  { %v353_v58 = vsel %vm196_vm2, %v347_v56, -inf }
 0x367   :  { %354 = vmax.xlane.f32.xlu0 %v353_v58 }
 0x374   :  { %448 = vrot.lane.b32.xlu1 %v2445_v39, %s2313_s4 }
 0x378   :  { %526 = vrot.lane.b32.xlu1 %v2447_v41, %s2314_s23 }
 0x37c   :  { %604 = vrot.lane.b32.xlu1 %v2445_v39, %s2314_s23 }
 0x37d   :  { %372 = vrot.lane.b32.xlu0 %v2447_v41, %s2313_s4 }
 0x3f0   :  { %v352_v59 = vpop.xlane.xlu1 %351 }
 0x3f1   :  { %v356_v60 = vsub.f32 %v269_v52, %v352_v59 }
 0x3f3   :  { %v358_v61 = vmul.f32 1.442695, %v356_v60 }
 0x3f4   :  { %v449_v62 = vpop.permute.xlu1 %448  ;;  %v355_v63 = vpop.xlane.xlu0 %354 }
 0x3f5   :  { %2245 = vpow2.f32 %v358_v61  ;;  %v357_v2 = vsub.f32 %v347_v56, %v355_v63  ;;  %2045 = vmatpush3.msra.mxu1 %v449_v62 }
 0x3f6   :  { %2054 = vmatprep.subr.mxu1 %v2309_v36 }
 0x3f7   :  { %v360_v3 = vmul.f32 1.442695, %v357_v2 }
 0x3f8   :  { %v373_v4 = vpop.permute.xlu0 %372  ;;  %v527_v9 = vpop.permute.xlu1 %526 }
 0x3f9   :  { %2247 = vpow2.f32 %v360_v3  ;;  %2040 = vmatpush3.msra.mxu0 %v373_v4 }
 0x3fa   :  { %2049 = vmatprep.subr.mxu0 %v2309_v36 }
 0x3fc   :  { %v605_v10 = vpop.permute.xlu1 %604 }
 0x3ff   :  { %v2246_v5 = vpop.eup %2245 }
 0x400   :  { %v362_v6 = vsel %vm196_vm2, %v2246_v5, 0.0 }
 0x401   :  { %363 = vadd.xlane.f32.xlu0 %v362_v6 }
 0x403   :  { %v2248_v7 = vpop.eup %2247 }
 0x404   :  { %v365_v8 = vsel %vm196_vm2, %v2248_v7, 0.0 }
 0x405   :  { %366 = vadd.xlane.f32.xlu1 %v365_v8 }
 0x416   :  { %602 = vrot.lane.b32.xlu1 %v2462_v45, %s2315_s24 }
 0x417   :  { %524 = vrot.lane.b32.xlu0 %v2453_v43, %s2315_s24 }
 0x48e   :  { %v364_v11 = vpop.xlane.xlu0 %363 }
 0x48f   :  { %2249 = vrcp.f32 %v364_v11 }
 0x492   :  { %v367_v12 = vpop.xlane.xlu1 %366  ;;  %v525_v17 = vpop.permute.xlu0 %524 }
 0x493   :  { %2251 = vrcp.f32 %v367_v12 }
 0x496   :  { %v603_v18 = vpop.permute.xlu1 %602 }
 0x499   :  { %v2250_v13 = vpop.eup %2249 }
 0x49a   :  { %v369_v14 = vmul.f32 %v2250_v13, %v2246_v5 }
 0x49c   :  { %2042 = vmatmul.mubr.msk.f32.vlgmr.msra.gmra.mrb[0].mxu0 %vm196_vm2, %v369_v14 }
 0x49d   :  { %v2252_v15 = vpop.eup %2251  ;;  %2050 = vmatpush3.xpose.msk.msra.mxu0 %vm196_vm2, %v527_v9  ;;  %2051 = vmatprep.mubr.msk.f32.mxu0 %vm2310_vm1, %v2309_v36 }
 0x49e   :  { %v371_v16 = vmul.f32 %v2252_v15, %v2248_v7  ;;  %2059 = vmatprep.subr.mxu0 %v2309_v36 }
 0x4a0   :  { %2047 = vmatmul.mubr.msk.f32.vlgmr.msra.gmra.mrb[6].mxu1 %vm196_vm2, %v371_v16  ;;  %2052 = vmatmul.mubr.msk.f32.vlgmr.msra.gmra.mrb[2].mxu0 %vm196_vm2, %v525_v17 }
 0x4a1   :  { %2055 = vmatpush3.xpose.msk.msra.mxu1 %vm196_vm2, %v605_v10  ;;  %2056 = vmatprep.mubr.msk.f32.mxu1 %vm2310_vm1, %v2309_v36 }
 0x4a2   :  { %2064 = vmatprep.subr.mxu1 %v2309_v36  ;;  %2061 = vmatprep.mubr.msk.f32.mxu0 %vm2310_vm1, %v2309_v36 }
 0x4a4   :  { %2057 = vmatmul.mubr.msk.f32.vlgmr.msra.gmra.mrb[8].mxu1 %vm196_vm2, %v603_v18 }
 0x4a5   :  { %2066 = vmatprep.mubr.msk.f32.mxu1 %vm2310_vm1, %v2309_v36 }
 0x56f   :  { %v2501_v19 = vpop.f32.mrb[0].mxu0 }
 0x570   :  { %v2043_v20 = vpop.f32.mrb[1].mxu0 }
 0x573   :  { %v2503_v21 = vpop.f32.mrb[6].mxu1  ;;  %v598_v22 = vpop.f32.mrb[2].mxu0 }
 0x574   :  { %v599_v23 = vadd.f32 %v598_v22, %v2469_v50  ;;  %v2048_v24 = vpop.f32.mrb[7].mxu1  ;;  %v2053_v25 = vpop.f32.mrb[3].mxu0 }
 0x576   :  { %v680_v26 = vsel %vm196_vm2, %v599_v23, -inf }
 0x577   :  { %681 = vmax.xlane.f32.xlu0 %v680_v26  ;;  %v676_v27 = vpop.f32.mrb[8].mxu1 }
 0x578   :  { %v677_v28 = vadd.f32 %v676_v27, %v2469_v50  ;;  %v2058_v29 = vpop.f32.mrb[9].mxu1 }
 0x57a   :  { %v683_v30 = vsel %vm196_vm2, %v677_v28, -inf }
 0x57b   :  { %684 = vmax.xlane.f32.xlu1 %v683_v30 }
 0x58c   :  { %778 = vrot.lane.b32.xlu1 %v2445_v39, %s2316_s25 }
 0x58d   :  { %702 = vrot.lane.b32.xlu0 %v2447_v41, %s2316_s25 }
 0x590   :  { %856 = vrot.lane.b32.xlu1 %v2447_v41, %s2317_s26 }
 0x594   :  { %934 = vrot.lane.b32.xlu1 %v2445_v39, %s2317_s26 }
 0x598   :  { %932 = vrot.lane.b32.xlu1 %v2462_v45, %s2318_s27 }
 0x604   :  { %v682_v31 = vpop.xlane.xlu0 %681 }
 0x605   :  { %v686_v32 = vsub.f32 %v599_v23, %v682_v31 }
 0x607   :  { %v688_v33 = vmul.f32 1.442695, %v686_v32 }
 0x608   :  { %v703_v34 = vpop.permute.xlu0 %702  ;;  %v685_v35 = vpop.xlane.xlu1 %684 }
 0x609   :  { %2253 = vpow2.f32 %v688_v33  ;;  %v687_v37 = vsub.f32 %v677_v28, %v685_v35  ;;  %2060 = vmatpush3.msra.mxu0 %v703_v34 }
 0x60a   :  { %2069 = vmatprep.subr.mxu0 %v2309_v36 }
 0x60b   :  { %v690_v38 = vmul.f32 1.442695, %v687_v37 }
 0x60c   :  { %v779_v40 = vpop.permute.xlu1 %778 }
 0x60d   :  { %2255 = vpow2.f32 %v690_v38  ;;  %2065 = vmatpush3.msra.mxu1 %v779_v40 }
 0x60e   :  { %2074 = vmatprep.subr.mxu1 %v2309_v36 }
 0x610   :  { %v857_v51 = vpop.permute.xlu1 %856 }
 0x613   :  { %v2254_v42 = vpop.eup %2253 }
 0x614   :  { %v692_v44 = vsel %vm196_vm2, %v2254_v42, 0.0  ;;  %v935_v55 = vpop.permute.xlu1 %934 }
 0x615   :  { %693 = vadd.xlane.f32.xlu0 %v692_v44 }
 0x617   :  { %v2256_v46 = vpop.eup %2255 }
 0x618   :  { %v695_v47 = vsel %vm196_vm2, %v2256_v46, 0.0  ;;  %v933_v58 = vpop.permute.xlu1 %932 }
 0x619   :  { %696 = vadd.xlane.f32.xlu0 %v695_v47 }
 0x62f   :  { %854 = vrot.lane.b32.xlu0 %v2453_v43, %s2318_s27 }
 0x6a2   :  { %v694_v48 = vpop.xlane.xlu0 %693 }
 0x6a3   :  { %2257 = vrcp.f32 %v694_v48 }
 0x6a6   :  { %v697_v49 = vpop.xlane.xlu0 %696 }
 0x6a7   :  { %2259 = vrcp.f32 %v697_v49 }
 0x6aa   :  { %v855_v57 = vpop.permute.xlu0 %854 }
 0x6ad   :  { %v2258_v52 = vpop.eup %2257 }
 0x6ae   :  { %v699_v53 = vmul.f32 %v2258_v52, %v2254_v42 }
 0x6b0   :  { %2062 = vmatmul.mubr.msk.f32.vlgmr.msra.gmra.mrb[4].mxu0 %vm196_vm2, %v699_v53 }
 0x6b1   :  { %v2260_v54 = vpop.eup %2259  ;;  %2070 = vmatpush3.xpose.msk.msra.mxu0 %vm196_vm2, %v857_v51  ;;  %2071 = vmatprep.mubr.msk.f32.mxu0 %vm2310_vm1, %v2309_v36 }
 0x6b2   :  { %v701_v56 = vmul.f32 %v2260_v54, %v2256_v46  ;;  %2079 = vmatprep.subr.mxu0 %v2309_v36 }
 0x6b4   :  { %2067 = vmatmul.mubr.msk.f32.vlgmr.msra.gmra.mrb[10].mxu1 %vm196_vm2, %v701_v56  ;;  %2072 = vmatmul.mubr.msk.f32.vlgmr.msra.gmra.mrb[6].mxu0 %vm196_vm2, %v855_v57 }
 0x6b5   :  { %2075 = vmatpush3.xpose.msk.msra.mxu1 %vm196_vm2, %v935_v55  ;;  %2076 = vmatprep.mubr.msk.f32.mxu1 %vm2310_vm1, %v2309_v36 }
 0x6b6   :  { %2084 = vmatprep.subr.mxu1 %v2309_v36  ;;  %2081 = vmatprep.mubr.msk.f32.mxu0 %vm2310_vm1, %v2309_v36 }
 0x6b8   :  { %2077 = vmatmul.mubr.msk.f32.vlgmr.msra.gmra.mrb[12].mxu1 %vm196_vm2, %v933_v58 }
 0x6b9   :  { %2086 = vmatprep.mubr.msk.f32.mxu1 %vm2310_vm1, %v2309_v36 }
 0x783   :  { %v2535_v59 = vpop.f32.mrb[4].mxu0 }
 0x784   :  { %v2063_v60 = vpop.f32.mrb[5].mxu0 }
 0x787   :  { %v2537_v61 = vpop.f32.mrb[10].mxu1  ;;  %v928_v62 = vpop.f32.mrb[6].mxu0 }
 0x788   :  { %v929_v63 = vadd.f32 %v928_v62, %v2469_v50  ;;  %v2068_v2 = vpop.f32.mrb[11].mxu1  ;;  %v2073_v3 = vpop.f32.mrb[7].mxu0 }
 0x789   :  { %v1546_v2 = vld [vmem:[%s2714_s5] sm:$0xff] }
 0x78a   :  { %v1010_v4 = vsel %vm196_vm2, %v929_v63, -inf }
 0x78b   :  { %1011 = vmax.xlane.f32.xlu0 %v1010_v4  ;;  %v1006_v5 = vpop.f32.mrb[12].mxu1  ;;  %v1548_v4 = vld [vmem:[%s2714_s5 + $0x10] sm:$0xff] }
 0x78c   :  { %v1007_v6 = vadd.f32 %v1006_v5, %v2469_v50  ;;  %v2078_v7 = vpop.f32.mrb[13].mxu1  ;;  %v1549_v5 = vld [vmem:[%s2714_s5 + $0x18] sm:$0xff] }
 0x78e   :  { %v1013_v8 = vsel %vm196_vm2, %v1007_v6, -inf }
 0x78f   :  { %1014 = vmax.xlane.f32.xlu1 %v1013_v8 }
 0x7a0   :  { %1108 = vrot.lane.b32.xlu1 %v2445_v39, %s2319_s28 }
 0x7a1   :  { %1032 = vrot.lane.b32.xlu0 %v2447_v41, %s2319_s28 }
 0x7a4   :  { %1186 = vrot.lane.b32.xlu1 %v2447_v41, %s2320_s0 }
 0x7a8   :  { %1264 = vrot.lane.b32.xlu1 %v2445_v39, %s2320_s0 }
 0x7ac   :  { %1262 = vrot.lane.b32.xlu1 %v2462_v45, %s2321_s29 }
 0x818   :  { %v1012_v9 = vpop.xlane.xlu0 %1011 }
 0x819   :  { %v1016_v10 = vsub.f32 %v929_v63, %v1012_v9 }
 0x81b   :  { %v1018_v11 = vmul.f32 1.442695, %v1016_v10 }
 0x81c   :  { %v1033_v12 = vpop.permute.xlu0 %1032  ;;  %v1015_v13 = vpop.xlane.xlu1 %1014 }
 0x81d   :  { %2261 = vpow2.f32 %v1018_v11  ;;  %v1017_v14 = vsub.f32 %v1007_v6, %v1015_v13  ;;  %2080 = vmatpush3.msra.mxu0 %v1033_v12  ;;  %v2178_v6 = vpack.c.bf16 %v1549_v5, %v1548_v4  ;;  %v1797_v4 = vld [vmem:[%s2720_s11 + $0x18] sm:$0xff] }
 0x81e   :  { %2089 = vmatprep.subr.mxu0 %v2309_v36 }
 0x81f   :  { %v1020_v15 = vmul.f32 1.442695, %v1017_v14 }
 0x820   :  { %v1109_v16 = vpop.permute.xlu1 %1108 }
 0x821   :  { %2263 = vpow2.f32 %v1020_v15  ;;  %2085 = vmatpush3.msra.mxu1 %v1109_v16 }
 0x822   :  { %2094 = vmatprep.subr.mxu1 %v2309_v36 }
 0x824   :  { %v1187_v24 = vpop.permute.xlu1 %1186 }
 0x827   :  { %v2262_v17 = vpop.eup %2261 }
 0x828   :  { %v1022_v18 = vsel %vm196_vm2, %v2262_v17, 0.0  ;;  %v1265_v28 = vpop.permute.xlu1 %1264 }
 0x829   :  { %1023 = vadd.xlane.f32.xlu0 %v1022_v18 }
 0x82b   :  { %v2264_v45 = vpop.eup %2263 }
 0x82c   :  { %v1025_v20 = vsel %vm196_vm2, %v2264_v45, 0.0  ;;  %v1263_v30 = vpop.permute.xlu1 %1262 }
 0x82d   :  { %1026 = vadd.xlane.f32.xlu0 %v1025_v20 }
 0x843   :  { %1184 = vrot.lane.b32.xlu0 %v2453_v43, %s2321_s29 }
 0x8b6   :  { %v1024_v22 = vpop.xlane.xlu0 %1023 }
 0x8b7   :  { %2265 = vrcp.f32 %v1024_v22 }
 0x8ba   :  { %v1027_v23 = vpop.xlane.xlu0 %1026 }
 0x8bb   :  { %2267 = vrcp.f32 %v1027_v23 }
 0x8be   :  { %v1185_v43 = vpop.permute.xlu0 %1184 }
 0x8c1   :  { %v2266_v25 = vpop.eup %2265 }
 0x8c2   :  { %v1029_v26 = vmul.f32 %v2266_v25, %v2262_v17 }
 0x8c4   :  { %2082 = vmatmul.mubr.msk.f32.vlgmr.msra.gmra.mrb[8].mxu0 %vm196_vm2, %v1029_v26 }
 0x8c5   :  { %v2268_v27 = vpop.eup %2267  ;;  %2090 = vmatpush3.xpose.msk.msra.mxu0 %vm196_vm2, %v1187_v24  ;;  %2091 = vmatprep.mubr.msk.f32.mxu0 %vm2310_vm1, %v2309_v36  ;;  %v1941_v24 = vld [vmem:[%s2715_s6] ss:$0 sm:$0xff] }
 0x8c6   :  { %v1031_v29 = vmul.f32 %v2268_v27, %v2264_v45  ;;  %2099 = vmatprep.subr.mxu0 %v2309_v36 }
 0x8c8   :  { %2087 = vmatmul.mubr.msk.f32.vlgmr.msra.gmra.mrb[14].mxu1 %vm196_vm2, %v1031_v29  ;;  %2092 = vmatmul.mubr.msk.f32.vlgmr.msra.gmra.mrb[10].mxu0 %vm196_vm2, %v1185_v43 }
 0x8c9   :  { %2095 = vmatpush3.xpose.msk.msra.mxu1 %vm196_vm2, %v1265_v28  ;;  %2096 = vmatprep.mubr.msk.f32.mxu1 %vm2310_vm1, %v2309_v36 }
 0x8ca   :  { %2104 = vmatprep.subr.mxu1 %v2309_v36  ;;  %2101 = vmatprep.mubr.msk.f32.mxu0 %vm2310_vm1, %v2309_v36 }
 0x8cc   :  { %2097 = vmatmul.mubr.msk.f32.vlgmr.msra.gmra.mrb[16].mxu1 %vm196_vm2, %v1263_v30 }
 0x8cd   :  { %2106 = vmatprep.mubr.msk.f32.mxu1 %vm2310_vm1, %v2309_v36 }
 0x997   :  { %v1104_v31 = vpop.f32.mrb[8].mxu0 }
 0x998   :  { %v2083_v32 = vpop.f32.mrb[9].mxu0 }
 0x99b   :  { %v1180_v33 = vpop.f32.mrb[14].mxu1  ;;  %v1258_v34 = vpop.f32.mrb[10].mxu0 }
 0x99c   :  { %v1259_v35 = vadd.f32 %v1258_v34, %v2469_v50  ;;  %v2088_v37 = vpop.f32.mrb[15].mxu1  ;;  %v2093_v38 = vpop.f32.mrb[11].mxu0 }
 0x99e   :  { %v1340_v40 = vsel %vm196_vm2, %v1259_v35, -inf }
 0x99f   :  { %1341 = vmax.xlane.f32.xlu0 %v1340_v40  ;;  %v1336_v42 = vpop.f32.mrb[16].mxu1  ;;  %v1684_v40 = vld [vmem:[%s2718_s9] sm:$0xff] }
 0x9a0   :  { %v1337_v44 = vadd.f32 %v1336_v42, %v2469_v50  ;;  %v2098_v46 = vpop.f32.mrb[17].mxu1  ;;  %v1685_v42 = vld [vmem:[%s2718_s9 + $0x8] sm:$0xff] }
 0x9a1   :  { %v1686_v46 = vld [vmem:[%s2718_s9 + $0x10] sm:$0xff] }
 0x9a2   :  { %v1343_v47 = vsel %vm196_vm2, %v1337_v44, -inf }
 0x9a3   :  { %1344 = vmax.xlane.f32.xlu1 %v1343_v47  ;;  %v1687_v47 = vld [vmem:[%s2718_s9 + $0x18] sm:$0xff] }
 0x9b4   :  { %1438 = vrot.lane.b32.xlu1 %v2445_v39, %s2322_s30 }
 0x9b8   :  { %1516 = vrot.lane.b32.xlu1 %v2535_v59, %s2323_s14 }
 0x9bc   :  { %1518 = vrot.lane.b32.xlu1 %v2537_v61, %s2323_s14 }
 0x9c0   :  { %1526 = vrot.lane.b32.xlu1 %v1180_v33, %s2324_s15 }
 0xa2c   :  { %v1342_v36 = vpop.xlane.xlu0 %1341 }
 0xa2d   :  { %v1346_v48 = vsub.f32 %v1259_v35, %v1342_v36  ;;  %v2186_v36 = vpack.c.bf16 %v1687_v47, %v1686_v46 }
 0xa2f   :  { %v1348_v49 = vmul.f32 1.442695, %v1346_v48  ;;  %v1794_v48 = vld [vmem:[%s2720_s11] sm:$0xff] }
 0xa30   :  { %v1345_v50 = vpop.xlane.xlu1 %1344 }
 0xa31   :  { %2269 = vpow2.f32 %v1348_v49  ;;  %v1347_v51 = vsub.f32 %v1337_v44, %v1345_v50  ;;  %v2182_v44 = vpack.c.bf16 %v1685_v42, %v1684_v40  ;;  %v1795_v49 = vld [vmem:[%s2720_s11 + $0x8] sm:$0xff] }
 0xa32   :  { %v2190_v50 = vpack.c.bf16 %v1795_v49, %v1794_v48  ;;  %v1949_v49 = vld [vmem:[%s2721_s12] ss:$0 sm:$0xff] }
 0xa33   :  { %v1350_v52 = vmul.f32 1.442695, %v1347_v51 }
 0xa34   :  { %v1439_v53 = vpop.permute.xlu1 %1438 }
 0xa35   :  { %2271 = vpow2.f32 %v1350_v52  ;;  %2105 = vmatpush3.msra.mxu1 %v1439_v53 }
 0xa38   :  { %v1517_v11 = vpop.permute.xlu1 %1516 }
 0xa39   :  { %v1538_v14 = vsel %vm196_vm2, %v2501_v19, %v1517_v11 }
 0xa3b   :  { %v2270_v39 = vpop.eup %2269 }
 0xa3c   :  { %v1352_v54 = vsel %vm196_vm2, %v2270_v39, 0.0  ;;  %v1519_v12 = vpop.permute.xlu1 %1518 }
 0xa3d   :  { %1353 = vadd.xlane.f32.xlu0 %v1352_v54  ;;  %v1539_v45 = vsel %vm196_vm2, %v2503_v21, %v1519_v12  ;;  %v1802_v12 = vld [vmem:[%s2720_s11 + $0x40] sm:$0xff] }
 0xa3f   :  { %v2272_v55 = vpop.eup %2271 }
 0xa40   :  { %v1355_v56 = vsel %vm196_vm2, %v2272_v55, 0.0  ;;  %v1527_v15 = vpop.permute.xlu1 %1526 }
 0xa41   :  { %1356 = vadd.xlane.f32.xlu0 %v1355_v56  ;;  %v1542_v20 = vsel %vm1540_vm5, %v1539_v45, %v1527_v15  ;;  %v1804_v15 = vld [vmem:[%s2720_s11 + $0x50] sm:$0xff]  ;;  %v1807_v45 = vld [vmem:[%s2720_s11 + $0x68] sm:$0xff] }
 0xa57   :  { %1362 = vrot.lane.b32.xlu0 %v2447_v41, %s2322_s30  ;;  %v1547_v41 = vld [vmem:[%s2714_s5 + $0x8] sm:$0xff] }
 0xa58   :  { %v2174_v3 = vpack.c.bf16 %v1547_v41, %v1546_v2 }
 0xa5a   :  { %2175 = vmatprep.subr.bf16.mxu1 %v2174_v3 }
 0xa5b   :  { %1524 = vrot.lane.b32.xlu0 %v1104_v31, %s2324_s15 }
 0xaca   :  { %v1354_v57 = vpop.xlane.xlu0 %1353 }
 0xacb   :  { %2273 = vrcp.f32 %v1354_v57  ;;  %v1944_v57 = vld [vmem:[%s2716_s7] ss:$0 sm:$0xff] }
 0xace   :  { %v1357_v58 = vpop.xlane.xlu0 %1356 }
 0xacf   :  { %2275 = vrcp.f32 %v1357_v58 }
 0xad2   :  { %v1363_v59 = vpop.permute.xlu0 %1362 }
 0xad3   :  { %2100 = vmatpush3.msra.mxu0 %v1363_v59  ;;  %v1945_v59 = vld [vmem:[%s2717_s8] ss:$0 sm:$0xff]  ;;  %s2326_s8 = smov [#allocation2]  }
 0xad4   :  { %2191 = vmatprep.subr.bf16.mxu0 %v2190_v50  ;;  %s1901_s21 = sshll.u32 %s2326_s8, 4  ;;  %s1902_s21 = int_to_ptr.vmem [resolvable:$true] %s1901_s21 }
 0xad5   :  { %v2274_v60 = vpop.eup %2273  ;;  %s2285_s1 = scalar_lea.vmem %s1902_s21, 256  ;;  %p2290_p1 = scmp.lt.s32.totalorder %s1902_s21, %s1902_s21 }
 0xad6   :  { %v1359_v61 = vmul.f32 %v2274_v60, %v2270_v39  ;;  %v1525_v13 = vpop.permute.xlu0 %1524  ;;  %p2286_p0 = scmp.ne.s32.totalorder %s1902_s21, %s2285_s1  ;;  %p2291_p2 = scmp.lt.s32.totalorder %s2285_s1, %s2285_s1 }
 0xad7   :  { %v1541_v16 = vsel %vm1540_vm5, %v1538_v14, %v1525_v13  ;;  %v1803_v13 = vld [vmem:[%s2720_s11 + $0x48] sm:$0xff] }
 0xad8   :  { %2102 = vmatmul.mubr.msk.f32.vlgmr.msra.gmra.mrb[12].mxu0 %vm196_vm2, %v1359_v61  ;;  %v2206_v14 = vpack.c.bf16 %v1803_v13, %v1802_v12  ;;  %p2292_p3 = por %p2291_p2, %p2290_p1 }
 0xad9   :  { %v2276_v62 = vpop.eup %2275  ;;  %2193 = vmatpush3.bf16.msra.mxu0 %v2190_v50 }
 0xada   :  { %v1361_v63 = vmul.f32 %v2276_v62, %v2272_v55  ;;  %p2293_p4 = pnand %p2292_p3, %p2286_p0 }
 0xadc   :  { %2107 = vmatmul.mubr.msk.f32.vlgmr.msra.gmra.mrb[18].mxu1 %vm196_vm2, %v1361_v63 }
 0xadd   :  { %2177 = vmatpush3.bf16.msra.mxu1 %v2174_v3  ;;  %v1796_v3 = vld [vmem:[%s2720_s11 + $0x10] sm:$0xff] }
 0xade   :  { %2179 = vmatprep.subr.bf16.mxu1 %v2178_v6  ;;  %v2194_v5 = vpack.c.bf16 %v1797_v4, %v1796_v3 }
 0xae0   :  { %2195 = vmatprep.subr.bf16.mxu0 %v2194_v5 }
 0xae1   :  { %2181 = vmatpush3.bf16.msra.mxu1 %v2178_v6  ;;  %2197 = vmatpush3.bf16.msra.mxu0 %v2194_v5  ;;  %v1798_v6 = vld [vmem:[%s2720_s11 + $0x20] sm:$0xff] }
 0xae2   :  { %2183 = vmatprep.subr.bf16.mxu1 %v2182_v44 }
 0xbab   :  { %v1434_v7 = vpop.f32.mrb[12].mxu0 }
 0xbac   :  { %1532 = vrot.lane.b32.xlu0 %v1434_v7, %s2325_s2  ;;  %v2103_v8 = vpop.f32.mrb[13].mxu0  ;;  %v1799_v7 = vld [vmem:[%s2720_s11 + $0x28] sm:$0xff] }
 0xbad   :  { %v2198_v8 = vpack.c.bf16 %v1799_v7, %v1798_v6 }
 0xbaf   :  { %v1510_v9 = vpop.f32.mrb[18].mxu1  ;;  %2199 = vmatprep.subr.bf16.mxu0 %v2198_v8 }
 0xbb0   :  { %1534 = vrot.lane.b32.xlu1 %v1510_v9, %s2325_s2  ;;  %v2108_v10 = vpop.f32.mrb[19].mxu1  ;;  %2201 = vmatpush3.bf16.msra.mxu0 %v2198_v8  ;;  %v1800_v9 = vld [vmem:[%s2720_s11 + $0x30] sm:$0xff] }
 0xbb1   :  { %v1801_v10 = vld [vmem:[%s2720_s11 + $0x38] sm:$0xff] }
 0xbb2   :  { %v2202_v11 = vpack.c.bf16 %v1801_v10, %v1800_v9 }
 0xbb4   :  { %2203 = vmatprep.subr.bf16.mxu0 %v2202_v11 }
 0xbb5   :  { %2205 = vmatpush3.bf16.msra.mxu0 %v2202_v11 }
 0xbb6   :  { %2207 = vmatprep.subr.bf16.mxu0 %v2206_v14 }
 0xbb9   :  { %2209 = vmatpush3.bf16.msra.mxu0 %v2206_v14 }
 0xc1e   :  { %v1533_v17 = vpop.permute.xlu0 %1532 }
 0xc1f   :  { %v1544_v18 = vsel %vm1543_vm4, %v1541_v16, %v1533_v17  ;;  %v1805_v16 = vld [vmem:[%s2720_s11 + $0x58] sm:$0xff] }
 0xc20   :  { %2117 = vmatprep.mubr.msk.f32.mxu1 %vm49_vm0, %v1544_v18  ;;  %v2210_v17 = vpack.c.bf16 %v1805_v16, %v1804_v15  ;;  %v1806_v18 = vld [vmem:[%s2720_s11 + $0x60] sm:$0xff] }
 0xc22   :  { %v1535_v22 = vpop.permute.xlu1 %1534  ;;  %2211 = vmatprep.subr.bf16.mxu0 %v2210_v17 }
 0xc23   :  { %v1545_v23 = vsel %vm1543_vm4, %v1542_v20, %v1535_v22  ;;  %v2214_v20 = vpack.c.bf16 %v1807_v45, %v1806_v18  ;;  %v1808_v22 = vld [vmem:[%s2720_s11 + $0x70] sm:$0xff]  ;;  %2213 = vmatpush3.bf16.msra.mxu0 %v2210_v17 }
 0xc24   :  { %2118 = vmatmul.mubr.msk.f32.vlgmr.msra.gmra.mrb[20].mxu1 %vm49_vm0, %v1545_v23  ;;  %v1809_v23 = vld [vmem:[%s2720_s11 + $0x78] sm:$0xff] }
 0xc25   :  { %2185 = vmatpush3.bf16.msra.mxu1 %v2182_v44  ;;  %2215 = vmatprep.subr.bf16.mxu0 %v2214_v20 }
 0xc26   :  { %2187 = vmatprep.subr.bf16.mxu1 %v2186_v36 }
 0xc27   :  { %2217 = vmatpush3.bf16.msra.mxu0 %v2214_v20 }
 0xc29   :  { %2189 = vmatpush3.bf16.msra.mxu1 %v2186_v36 }
 0xcf7   :  { %v2119_v19 = vpop.f32.mrb[20].mxu1 }
 0xcf8   :  { %v1635_v25 = vadd.f32 %v2119_v19, %v1941_v24  ;;  %v1629_v26 = vpop.f32.mrb[21].mxu1  ;;  %v1946_v19 = vld [vmem:[%s2719_s10] ss:$0 sm:$0xff] }
 0xcf9   :  { %v1630_v27 = vadd.f32 %v1941_v24, %v1629_v26  ;;  %v2218_v24 = vpack.c.bf16 %v1809_v23, %v1808_v22 }
 0xcfa   :  { %v2605_v28 = vadd.f32 %v1635_v25, %v2406_v1 }
 0xcfb   :  { %v2608_v29 = vadd.f32 %v1630_v27, %v2401_v0  ;;  %2219 = vmatprep.subr.bf16.mxu0 %v2218_v24 }
 0xcfc   :  { %v1645_v21 = vsel %vm49_vm0, %v2605_v28, 0.0  ;;  %2221 = vmatpush3.bf16.msra.mxu0 %v2218_v24 }
 0xcfd   :  { %1646 = vadd.xlane.f32.xlu1 %v1645_v21  ;;  %v1642_v43 = vsel %vm49_vm0, %v2608_v29, 0.0 }
 0xcfe   :  { %1643 = vadd.xlane.f32.xlu0 %v1642_v43 }
 0xd8a   :  { %v1647_v30 = vpop.xlane.xlu1 %1646 }
 0xd8b   :  { %v1649_v31 = vmul.f32 0.03125, %v1647_v30  ;;  %v1644_v32 = vpop.xlane.xlu0 %1643 }
 0xd8c   :  { %v1648_v33 = vmul.f32 0.03125, %v1644_v32 }
 0xd8d   :  { %v1651_v34 = vsub.f32 %v2605_v28, %v1649_v31 }
 0xd8e   :  { %v1650_v1 = vsub.f32 %v2608_v29, %v1648_v33 }
 0xd8f   :  { %v1653_v37 = vmul.f32 %v1651_v34, %v1651_v34 }
 0xd90   :  { %v1652_v35 = vmul.f32 %v1650_v1, %v1650_v1 }
 0xd91   :  { %v1657_v38 = vsel %vm49_vm0, %v1653_v37, 0.0 }
 0xd92   :  { %v1654_v0 = vsel %vm49_vm0, %v1652_v35, 0.0 }
 0xd93   :  { %1655 = vadd.xlane.f32.xlu0 %v1654_v0 }
 0xd97   :  { %1658 = vadd.xlane.f32.xlu0 %v1657_v38 }
 0xe20   :  { %v1656_v51 = vpop.xlane.xlu0 %1655 }
 0xe21   :  { %v1660_v52 = vmul.f32 0.03125, %v1656_v51 }
 0xe23   :  { %v1662_v53 = vadd.f32 1e-05, %v1660_v52 }
 0xe24   :  { %v1659_v39 = vpop.xlane.xlu0 %1658 }
 0xe25   :  { %2277 = vrsqrt.f32 %v1662_v53  ;;  %v1661_v54 = vmul.f32 0.03125, %v1659_v39 }
 0xe27   :  { %v1663_v55 = vadd.f32 1e-05, %v1661_v54 }
 0xe29   :  { %2279 = vrsqrt.f32 %v1663_v55 }
 0xe2f   :  { %v2278_v56 = vpop.eup %2277 }
 0xe30   :  { %v1666_v58 = vmul.f32 %v2278_v56, %v1650_v1 }
 0xe32   :  { %v1674_v60 = vmul.f32 %v1944_v57, %v1666_v58 }
 0xe33   :  { %v2280_v61 = vpop.eup %2279 }
 0xe34   :  { %v1667_v62 = vmul.f32 %v2280_v61, %v1651_v34  ;;  %v1682_v63 = vadd.f32 %v1945_v59, %v1674_v60 }
 0xe36   :  { %v1675_v2 = vmul.f32 %v1944_v57, %v1667_v62  ;;  %2128 = vmatprep.mubr.msk.f32.mxu1 %vm49_vm0, %v1682_v63 }
 0xe38   :  { %v1683_v41 = vadd.f32 %v1945_v59, %v1675_v2 }
 0xe3a   :  { %2129 = vmatmul.mubr.msk.f32.vlgmr.msra.gmra.mrb[22].mxu1 %vm49_vm0, %v1683_v41 }
 0xf0d   :  { %v2130_v25 = vpop.f32.mrb[22].mxu1 }
 0xf0e   :  { %v1773_v26 = vadd.f32 %v2130_v25, %v1946_v19  ;;  %v1767_v27 = vpop.f32.mrb[23].mxu1 }
 0xf0f   :  { %v1768_v21 = vadd.f32 %v1946_v19, %v1767_v27 }
 0xf10   :  { %v1779_v43 = vmul.f32 0.044715, %v1773_v26  ;;  %v1777_v47 = vmul.f32 0.5, %v1773_v26 }
 0xf11   :  { %v1778_v30 = vmul.f32 0.044715, %v1768_v21  ;;  %v1776_v44 = vmul.f32 0.5, %v1768_v21 }
 0xf12   :  { %v1781_v31 = vmul.f32 %v1779_v43, %v1773_v26 }
 0xf13   :  { %v1780_v32 = vmul.f32 %v1778_v30, %v1768_v21 }
 0xf14   :  { %v1783_v33 = vmul.f32 %v1781_v31, %v1773_v26 }
 0xf15   :  { %v1782_v34 = vmul.f32 %v1780_v32, %v1768_v21 }
 0xf16   :  { %v1785_v1 = vadd.f32 %v1783_v33, %v1773_v26 }
 0xf17   :  { %v1784_v35 = vadd.f32 %v1782_v34, %v1768_v21 }
 0xf18   :  { %v1787_v0 = vmul.f32 0.7978846, %v1785_v1 }
 0xf19   :  { %v1786_v37 = vmul.f32 0.7978846, %v1784_v35 }
 0xf1a   :  { %2281 = vtanh.f32 %v1787_v0 }
 0xf1b   :  { %2283 = vtanh.f32 %v1786_v37 }
 0xf24   :  { %v2282_v38 = vpop.eup %2281 }
 0xf25   :  { %v2284_v40 = vpop.eup %2283  ;;  %v1791_v42 = vadd.f32 1.0, %v2282_v38 }
 0xf26   :  { %v1790_v46 = vadd.f32 1.0, %v2284_v40 }
 0xf27   :  { %v1793_v48 = vmul.f32 %v1791_v42, %v1777_v47 }
 0xf28   :  { %v1792_v36 = vmul.f32 %v1790_v46, %v1776_v44 }
 0xf2a   :  { %2163 = vmatprep.mubr.f32.mxu0 %v1792_v36 }
 0xf2b   :  { %2164 = vmatmul.mubr.f32.vlgmr.msra.gmra.mrb[14].mxu0 %v1793_v48 }
 0xffe   :  { %v2165_v50 = vpop.f32.mrb[14].mxu0 }
 0xfff   :  { %v1889_v51 = vadd.f32 %v2165_v50, %v1949_v49  ;;  %v1883_v52 = vpop.f32.mrb[15].mxu0 }
0x1000   :  { %v1884_v53 = vadd.f32 %v1949_v49, %v1883_v52 }
0x1001   :  { %v1893_v39 = vadd.f32 %v1889_v51, %v2605_v28 }
0x1002   :  { %v1892_v54 = vadd.f32 %v1884_v53, %v2608_v29 }
0x1003   :  { %1895 = vst.msk [vmem:[#allocation2 + $0x8] sm:$0xff] %vm49_vm0, %v1893_v39 }
0x1004   :  { %1894 = vst.msk [vmem:[#allocation2] sm:$0xff] %vm49_vm0, %v1892_v54 }
0x1005   :  { %2296 = shalt.err (!%p2293_p4)
}
0x1006   :  { %s2297_s5 = scalar_lea.hbm %s2722_s13, 256 }
0x1007   :  { %p2298_p5 = scmp.ne.s32.totalorder %s2722_s13, %s2297_s5  ;;  %p2301_p6 = scmp.lt.u32.totalorder %s2297_s5, %s2722_s13 }
0x1009   :  { %p2303_p7 = pnand %p2301_p6, %p2298_p5 }
0x100b   :  { %2306 = shalt.err (!%p2303_p7)
}
0x100c   :  { %s2327_s24 = smov 128  }
0x100d   :  { %1907 = dma.vmem_to_hbm [thread:$0]  %s1902_s21, 256, %s2722_s13, [#allocation3], %s2327_s24, %s2327_s24, %s2323_s14  }
0x100e   :  { %2307 = dma.done.wait [#allocation3], 256  }
0x100f   :  { %2308 = vsyncadd [#allocation3], 4294967040 }
0x1010   :  { %1911 = vsyncpa [#allocation3], 1 }

</bundles_post_ra>
